<compile_context>
chip_gen: v7x
topology: tpu7x:2x2x1
jax: 0.10.0
libtpu: 0.0.40
codegen_flags: <defaults>
</compile_context>

<pallas_src>
import functools

import jax
import jax.numpy as jnp
import numpy as np
from jax.experimental import pallas as pl
from jax.experimental.pallas import tpu as pltpu

ROWS_TILE_MAX = 256      # rows of 128 cells per grid step (= 32768 cells)


def _round_up(x, m):
    return (x + m - 1) // m * m


def _num_splits():
    """2-way 'parallel' split only on chips with 2 TensorCores (v7x)."""
    try:
        kind = jax.devices()[0].device_kind.lower()
    except Exception:
        return 1
    return 2 if "v7" in kind else 1


# ----------------------------------------------------------------------------
# Pallas kernel
# ----------------------------------------------------------------------------
def _yolo_loss_kernel(pred_ref, targ_ref, out_ref,
                      acc_cls, acc_reg, acc_con, acc_nob, *, inv_s):
    """pred_ref / targ_ref: (30, rows_tile, 128) channel-major tiles in VMEM.

    out_ref: (1, 8, 128) f32 block (one per split); row r, lane 0 holds
    [class, reg, contain, no_object][r] after the last tile of the split.
    acc_*: (rows_tile, 128) per-component VMEM accumulators.
    """
    t = pl.program_id(1)
    nt = pl.num_programs(1)

    @pl.when(t == 0)
    def _init():
        acc_cls[...] = jnp.zeros_like(acc_cls)
        acc_reg[...] = jnp.zeros_like(acc_reg)
        acc_con[...] = jnp.zeros_like(acc_con)
        acc_nob[...] = jnp.zeros_like(acc_nob)

    def ch(ref, i):  # one channel -> dense (rows_tile, 128) f32 slab
        return ref[i].astype(jnp.float32)

    # ---- masks --------------------------------------------------------------
    t0c = ch(targ_ref, 4)
    obj_b = t0c > 0.0
    objf = obj_b.astype(jnp.float32)
    noobjf = (t0c == 0.0).astype(jnp.float32)

    # ---- class loss (object cells, channels 10..29) -------------------------
    cd = (pred_ref[10:30].astype(jnp.float32)
          - targ_ref[10:30].astype(jnp.float32))          # (20, rt, 128)
    acc_cls[...] += objf * jnp.sum(cd * cd, axis=0)       # leading-axis sum

    # ---- per-channel box slabs ----------------------------------------------
    p0x, p0y, p0w, p0h, p0c = (ch(pred_ref, i) for i in range(0, 5))
    p1x, p1y, p1w, p1h, p1c = (ch(pred_ref, i) for i in range(5, 10))
    t0x, t0y, t0w, t0h = (ch(targ_ref, i) for i in range(0, 4))
    t1x, t1y, t1w, t1h = (ch(targ_ref, i) for i in range(5, 9))
    t1c = ch(targ_ref, 9)

    # ---- no-object loss (confidence channels 4 and 9) -----------------------
    d4 = p0c - t0c
    d9 = p1c - t1c
    acc_nob[...] += noobjf * (d4 * d4 + d9 * d9)

    # ---- IoU of the two pred boxes vs. target box 0 -------------------------
    # target corners / area hoisted: shared by both IoU computations
    tcx = t0x * inv_s
    tcy = t0y * inv_s
    thw = 0.5 * t0w
    thh = 0.5 * t0h
    tlt_x, tlt_y = tcx - thw, tcy - thh
    trb_x, trb_y = tcx + thw, tcy + thh
    tarea = (trb_x - tlt_x) * (trb_y - tlt_y)

    def iou_vs_target(bx, by, bw, bh):
        cx = bx * inv_s
        cy = by * inv_s
        hw = 0.5 * bw
        hh = 0.5 * bh
        plt_x, plt_y = cx - hw, cy - hh
        prb_x, prb_y = cx + hw, cy + hh
        iw = jnp.maximum(jnp.minimum(prb_x, trb_x) - jnp.maximum(plt_x, tlt_x), 0.0)
        ih = jnp.maximum(jnp.minimum(prb_y, trb_y) - jnp.maximum(plt_y, tlt_y), 0.0)
        inter = iw * ih
        parea = (prb_x - plt_x) * (prb_y - plt_y)
        denom = parea + tarea - inter
        # exact divide kept on purpose: the IoU feeds the responsible-box
        # selection and contain loss; 0/0 (padded cells) is guarded.
        return jnp.where(denom != 0.0, inter / denom, 0.0)

    iou0 = iou_vs_target(p0x, p0y, p0w, p0h)
    iou1 = iou_vs_target(p1x, p1y, p1w, p1h)
    best1 = iou1 > iou0                      # box 1 responsible (box 0 wins ties)
    max_iou = jnp.maximum(iou0, iou1)

    # responsible pred box (x, y, w, h, c) and matching target box (x, y, w, h)
    prx = jnp.where(best1, p1x, p0x)
    pry = jnp.where(best1, p1y, p0y)
    prw = jnp.where(best1, p1w, p0w)
    prh = jnp.where(best1, p1h, p0h)
    prc = jnp.where(best1, p1c, p0c)
    trx = jnp.where(best1, t1x, t0x)
    try_ = jnp.where(best1, t1y, t0y)
    trw = jnp.where(best1, t1w, t0w)
    trh = jnp.where(best1, t1h, t0h)

    # ---- regression loss -----------------------------------------------------
    dx = prx - trx
    dy = pry - try_
    # guard sqrt args on non-object rows so masked-out NaNs cannot leak in
    # (negative w/h on object rows is the same hazard as the torch code)
    pw_s = jnp.where(obj_b, prw, 1.0)
    ph_s = jnp.where(obj_b, prh, 1.0)
    tw_s = jnp.where(obj_b, trw, 1.0)
    th_s = jnp.where(obj_b, trh, 1.0)
    dw = jnp.sqrt(pw_s) - jnp.sqrt(tw_s)
    dh = jnp.sqrt(ph_s) - jnp.sqrt(th_s)
    acc_reg[...] += objf * (dx * dx + dy * dy + dw * dw + dh * dh)

    # ---- contain / confidence loss -------------------------------------------
    dc = prc - max_iou
    acc_con[...] += objf * (dc * dc)

    # ---- finalize: single cross-lane reduce on the last tile of this split ---
    @pl.when(t == nt - 1)
    def _finalize():
        s_cls = jnp.sum(acc_cls[...])
        s_reg = jnp.sum(acc_reg[...])
        s_con = jnp.sum(acc_con[...])
        s_nob = jnp.sum(acc_nob[...])
        row = jax.lax.broadcasted_iota(jnp.int32, (8, 128), 0)
        out_ref[0] = jnp.where(row == 0, s_cls,
                     jnp.where(row == 1, s_reg,
                     jnp.where(row == 2, s_con, s_nob)))


# ----------------------------------------------------------------------------
# Wrapper
# ----------------------------------------------------------------------------
def yolo_loss(pred_tensor, target_tensor, *, S, B=2, l_coord=5.0, l_noobj=0.5,
              l_class=4.0, input_dtype=jnp.float32):
    assert B == 2, "kernel hard-codes B=2 (same as the PyTorch module layout)"
    N = pred_tensor.shape[0]
    C = B * 5 + 20                     # 30
    R = N * S * S

    num_splits = _num_splits()

    # tile sizing: cells fold into (rows, 128); rows_tile multiple of 8
    rows_needed = pl.cdiv(R, 128)
    rows_tile = min(ROWS_TILE_MAX,
                    _round_up(pl.cdiv(rows_needed, num_splits), 8))
    tiles = pl.cdiv(rows_needed, num_splits * rows_tile)
    rows_total = num_splits * tiles * rows_tile
    r_pad = rows_total * 128

    # single fused prep pass: pad -> reshape -> channel-major transpose.
    # Padded cells are all-zero in pred AND target -> contribute 0 everywhere.
    # TODO(synk): produce the (30, rows, 128) layout upstream to drop this pass.
    def prep(x):
        x2 = x.reshape(R, C)
        if x2.dtype != input_dtype:
            x2 = x2.astype(input_dtype)
        x2 = jnp.pad(x2, ((0, r_pad - R), (0, 0)))
        return jnp.transpose(x2.reshape(rows_total, 128, C), (2, 0, 1))

    pred_cm = prep(pred_tensor)
    targ_cm = prep(target_tensor)

    in_spec = pl.BlockSpec((C, rows_tile, 128),
                           lambda c, t: (0, c * tiles + t, 0))
    out_spec = pl.BlockSpec((1, 8, 128), lambda c, t: (c, 0, 0))

    kernel = functools.partial(_yolo_loss_kernel, inv_s=1.0 / float(S))
    partials = pl.pallas_call(
        kernel,
        out_shape=jax.ShapeDtypeStruct((num_splits, 8, 128), jnp.float32),
        grid_spec=pltpu.PrefetchScalarGridSpec(
            num_scalar_prefetch=0,
            grid=(num_splits, tiles),
            in_specs=[in_spec, in_spec],
            out_specs=out_spec,
            scratch_shapes=[
                pltpu.VMEM((rows_tile, 128), jnp.float32),   # class
                pltpu.VMEM((rows_tile, 128), jnp.float32),   # regression
                pltpu.VMEM((rows_tile, 128), jnp.float32),   # contain
                pltpu.VMEM((rows_tile, 128), jnp.float32),   # no-object
            ]),
        compiler_params=pltpu.CompilerParams(
            dimension_semantics=("parallel", "arbitrary"),
            vmem_limit_bytes=48 * 1024 * 1024),
    )(pred_cm, targ_cm)

    # partials[c, r, 0] = [class, reg, contain, no_object][r] for split c
    comps = jnp.sum(partials[:, 0:4, 0], axis=0)     # (4,)
    class_loss, reg_loss, contain_loss, no_object_loss = (
        comps[0], comps[1], comps[2], comps[3])
    total_loss = (l_coord * reg_loss + l_coord * contain_loss
                  + l_noobj * no_object_loss + l_class * class_loss) / N
    return total_loss, comps


# ----------------------------------------------------------------------------
# Pure-JAX reference (dense masked math, identical sums) for correctness check
# ----------------------------------------------------------------------------
def yolo_loss_ref(pred_tensor, target_tensor, *, S, l_coord=5.0, l_noobj=0.5,
                  l_class=4.0):
    N = pred_tensor.shape[0]
    pred = pred_tensor.reshape(-1, 30).astype(jnp.float32)
    targ = target_tensor.reshape(-1, 30).astype(jnp.float32)

    tconf = targ[:, 4:5]
    objf = (tconf > 0.0).astype(jnp.float32)
    noobjf = (tconf == 0.0).astype(jnp.float32)

    cdiff = pred[:, 10:30] - targ[:, 10:30]
    class_loss = jnp.sum(objf * cdiff * cdiff)

    d4 = pred[:, 4:5] - targ[:, 4:5]
    d9 = pred[:, 9:10] - targ[:, 9:10]
    no_object_loss = jnp.sum(noobjf * (d4 * d4 + d9 * d9))

    def corners(box):
        xy = box[:, 0:2] / S
        half = 0.5 * box[:, 2:4]
        return xy - half, xy + half

    def pair_iou(b1, b2):
        lt1, rb1 = corners(b1)
        lt2, rb2 = corners(b2)
        lt = jnp.maximum(lt1, lt2)
        rb = jnp.minimum(rb1, rb2)
        wh = jnp.maximum(rb - lt, 0.0)
        inter = wh[:, 0:1] * wh[:, 1:2]
        a1 = (rb1[:, 0:1] - lt1[:, 0:1]) * (rb1[:, 1:2] - lt1[:, 1:2])
        a2 = (rb2[:, 0:1] - lt2[:, 0:1]) * (rb2[:, 1:2] - lt2[:, 1:2])
        denom = a1 + a2 - inter
        return jnp.where(denom != 0.0, inter / denom, 0.0)

    tbox0 = targ[:, 0:4]
    iou0 = pair_iou(pred[:, 0:4], tbox0)
    iou1 = pair_iou(pred[:, 5:9], tbox0)
    best1 = iou1 > iou0
    max_iou = jnp.maximum(iou0, iou1)

    pr = jnp.where(best1, pred[:, 5:10], pred[:, 0:5])
    tr = jnp.where(best1, targ[:, 5:10], targ[:, 0:5])

    dxy = pr[:, 0:2] - tr[:, 0:2]
    pwh = jnp.where(objf > 0.0, pr[:, 2:4], 1.0)
    twh = jnp.where(objf > 0.0, tr[:, 2:4], 1.0)
    dwh = jnp.sqrt(pwh) - jnp.sqrt(twh)
    reg_loss = jnp.sum(objf * (dxy * dxy)) + jnp.sum(objf * (dwh * dwh))

    dconf = pr[:, 4:5] - max_iou
    contain_loss = jnp.sum(objf * dconf * dconf)

    total = (l_coord * reg_loss + l_coord * contain_loss
             + l_noobj * no_object_loss + l_class * class_loss) / N
    return total, jnp.stack([class_loss, reg_loss, contain_loss,
                             no_object_loss])


# ----------------------------------------------------------------------------
# Demo
# ----------------------------------------------------------------------------
if __name__ == "__main__":
    S, B = 8, 2
    N = 2
    l_coord, l_noobj = 5.0, 0.5

    key = jax.random.PRNGKey(0)
    kp, kt, kc, km = jax.random.split(key, 4)

    # Predictions in (0, 1) so that w, h > 0 (sqrt stays real, as the torch
    # module implicitly assumes).
    pred = jax.random.uniform(kp, (N, S, S, B * 5 + 20), jnp.float32,
                              minval=0.05, maxval=0.95)

    # Targets: positive w/h everywhere; objectness (idx 4) is either exactly 0
    # (no object) or in (0.5, 1.0) (object present).
    target = jax.random.uniform(kt, (N, S, S, B * 5 + 20), jnp.float32,
                                minval=0.05, maxval=0.95)
    obj_mask = jax.random.bernoulli(km, 0.5, (N, S, S)).astype(jnp.float32)
    conf = 0.5 + 0.5 * jax.random.uniform(kc, (N, S, S), jnp.float32)
    target = target.at[..., 4].set(obj_mask * conf)

    total, components = yolo_loss(pred, target, S=S, B=B,
                                  l_coord=l_coord, l_noobj=l_noobj)
    total = jax.block_until_ready(total)

    total_ref, components_ref = yolo_loss_ref(pred, target, S=S,
                                              l_coord=l_coord, l_noobj=l_noobj)
    np.testing.assert_allclose(np.asarray(components),
                               np.asarray(components_ref), rtol=1e-4,
                               atol=1e-4)
    np.testing.assert_allclose(np.asarray(total), np.asarray(total_ref),
                               rtol=1e-4, atol=1e-4)

    print("KERNEL_OK")
</pallas_src>

<mosaic_0001>
module attributes {stable_mosaic.version = 11 : i64} {
  func.func @_yolo_loss_kernel(%arg0: i32, %arg1: i32, %arg2: memref<30x8x128xf32, #tpu.memory_space<vmem>>, %arg3: memref<30x8x128xf32, #tpu.memory_space<vmem>>, %arg4: memref<1x8x128xf32, #tpu.memory_space<vmem>>, %arg5: memref<8x128xf32, #tpu.memory_space<vmem>>, %arg6: memref<8x128xf32, #tpu.memory_space<vmem>>, %arg7: memref<8x128xf32, #tpu.memory_space<vmem>>, %arg8: memref<8x128xf32, #tpu.memory_space<vmem>>) attributes {dimension_semantics = [#tpu.dimension_semantics<parallel>, #tpu.dimension_semantics<arbitrary>], iteration_bounds = array<i64: 1, 1>, scalar_prefetch = 0 : i64, scratch_operands = 4 : i64, tpu.core_type = #tpu.core_type<tc>, window_params = [{transform_indices = @transform_0, window_bounds = array<i64: 30, 8, 128>}, {transform_indices = @transform_1, window_bounds = array<i64: 30, 8, 128>}, {transform_indices = @transform_2, window_bounds = array<i64: 1, 8, 128>}]} {
    %c0_i32 = arith.constant 0 : i32
    %0 = arith.cmpi eq, %arg1, %c0_i32 : i32
    %1 = arith.extui %0 : i1 to i32
    %c0_i32_0 = arith.constant 0 : i32
    %2 = arith.cmpi ne, %1, %c0_i32_0 : i32
    scf.if %2 {
      %cst_100 = arith.constant 0.000000e+00 : f32
      %197 = vector.broadcast %cst_100 : f32 to vector<8x128xf32>
      %c0_101 = arith.constant 0 : index
      %c0_102 = arith.constant 0 : index
      %198 = vector.load %arg5[%c0_101, %c0_102] : memref<8x128xf32, #tpu.memory_space<vmem>>, vector<8x128xf32>
      tpu.vector_store %arg5[%c0_101, %c0_102], %197 {strides = array<i32>} : memref<8x128xf32, #tpu.memory_space<vmem>>, vector<8x128xf32>,
      %cst_103 = arith.constant 0.000000e+00 : f32
      %199 = vector.broadcast %cst_103 : f32 to vector<8x128xf32>
      %c0_104 = arith.constant 0 : index
      %c0_105 = arith.constant 0 : index
      %200 = vector.load %arg6[%c0_104, %c0_105] : memref<8x128xf32, #tpu.memory_space<vmem>>, vector<8x128xf32>
      tpu.vector_store %arg6[%c0_104, %c0_105], %199 {strides = array<i32>} : memref<8x128xf32, #tpu.memory_space<vmem>>, vector<8x128xf32>,
      %cst_106 = arith.constant 0.000000e+00 : f32
      %201 = vector.broadcast %cst_106 : f32 to vector<8x128xf32>
      %c0_107 = arith.constant 0 : index
      %c0_108 = arith.constant 0 : index
      %202 = vector.load %arg7[%c0_107, %c0_108] : memref<8x128xf32, #tpu.memory_space<vmem>>, vector<8x128xf32>
      tpu.vector_store %arg7[%c0_107, %c0_108], %201 {strides = array<i32>} : memref<8x128xf32, #tpu.memory_space<vmem>>, vector<8x128xf32>,
      %cst_109 = arith.constant 0.000000e+00 : f32
      %203 = vector.broadcast %cst_109 : f32 to vector<8x128xf32>
      %c0_110 = arith.constant 0 : index
      %c0_111 = arith.constant 0 : index
      %204 = vector.load %arg8[%c0_110, %c0_111] : memref<8x128xf32, #tpu.memory_space<vmem>>, vector<8x128xf32>
      tpu.vector_store %arg8[%c0_110, %c0_111], %203 {strides = array<i32>} : memref<8x128xf32, #tpu.memory_space<vmem>>, vector<8x128xf32>,
    } else {
    }
    %c4 = arith.constant 4 : index
    %c0 = arith.constant 0 : index
    %c0_1 = arith.constant 0 : index
    %3 = vector.load %arg3[%c4, %c0, %c0_1] : memref<30x8x128xf32, #tpu.memory_space<vmem>>, vector<1x8x128xf32>
    %4 = vector.shape_cast %3 : vector<1x8x128xf32> to vector<8x128xf32>
    %cst = arith.constant 0.000000e+00 : f32
    %5 = vector.broadcast %cst : f32 to vector<8x128xf32>
    %6 = arith.cmpf ogt, %4, %5 : vector<8x128xf32>
    %7 = arith.extui %6 : vector<8x128xi1> to vector<8x128xi32>
    %8 = arith.sitofp %7 : vector<8x128xi32> to vector<8x128xf32>
    %cst_2 = arith.constant 0.000000e+00 : f32
    %9 = vector.broadcast %cst_2 : f32 to vector<8x128xf32>
    %10 = arith.cmpf oeq, %4, %9 : vector<8x128xf32>
    %11 = arith.extui %10 : vector<8x128xi1> to vector<8x128xi32>
    %12 = arith.sitofp %11 : vector<8x128xi32> to vector<8x128xf32>
    %c10 = arith.constant 10 : index
    %c0_3 = arith.constant 0 : index
    %c0_4 = arith.constant 0 : index
    %13 = vector.load %arg2[%c10, %c0_3, %c0_4] : memref<30x8x128xf32, #tpu.memory_space<vmem>>, vector<20x8x128xf32>
    %c10_5 = arith.constant 10 : index
    %c0_6 = arith.constant 0 : index
    %c0_7 = arith.constant 0 : index
    %14 = vector.load %arg3[%c10_5, %c0_6, %c0_7] : memref<30x8x128xf32, #tpu.memory_space<vmem>>, vector<20x8x128xf32>
    %15 = arith.subf %13, %14 : vector<20x8x128xf32>
    %c0_8 = arith.constant 0 : index
    %c0_9 = arith.constant 0 : index
    %16 = vector.load %arg5[%c0_8, %c0_9] : memref<8x128xf32, #tpu.memory_space<vmem>>, vector<8x128xf32>
    %17 = arith.mulf %15, %15 : vector<20x8x128xf32>
    %cst_10 = arith.constant dense<0.000000e+00> : vector<8x128xf32>
    %18 = vector.multi_reduction <add>, %17, %cst_10 [0] : vector<20x8x128xf32> to vector<8x128xf32>
    %19 = arith.mulf %8, %18 : vector<8x128xf32>
    %20 = arith.addf %16, %19 : vector<8x128xf32>
    %c0_11 = arith.constant 0 : index
    %c0_12 = arith.constant 0 : index
    %21 = vector.load %arg5[%c0_11, %c0_12] : memref<8x128xf32, #tpu.memory_space<vmem>>, vector<8x128xf32>
    tpu.vector_store %arg5[%c0_11, %c0_12], %20 {strides = array<i32>} : memref<8x128xf32, #tpu.memory_space<vmem>>, vector<8x128xf32>,
    %c0_13 = arith.constant 0 : index
    %c0_14 = arith.constant 0 : index
    %c0_15 = arith.constant 0 : index
    %22 = vector.load %arg2[%c0_13, %c0_14, %c0_15] : memref<30x8x128xf32, #tpu.memory_space<vmem>>, vector<1x8x128xf32>
    %23 = vector.shape_cast %22 : vector<1x8x128xf32> to vector<8x128xf32>
    %c1 = arith.constant 1 : index
    %c0_16 = arith.constant 0 : index
    %c0_17 = arith.constant 0 : index
    %24 = vector.load %arg2[%c1, %c0_16, %c0_17] : memref<30x8x128xf32, #tpu.memory_space<vmem>>, vector<1x8x128xf32>
    %25 = vector.shape_cast %24 : vector<1x8x128xf32> to vector<8x128xf32>
    %c2 = arith.constant 2 : index
    %c0_18 = arith.constant 0 : index
    %c0_19 = arith.constant 0 : index
    %26 = vector.load %arg2[%c2, %c0_18, %c0_19] : memref<30x8x128xf32, #tpu.memory_space<vmem>>, vector<1x8x128xf32>
    %27 = vector.shape_cast %26 : vector<1x8x128xf32> to vector<8x128xf32>
    %c3 = arith.constant 3 : index
    %c0_20 = arith.constant 0 : index
    %c0_21 = arith.constant 0 : index
    %28 = vector.load %arg2[%c3, %c0_20, %c0_21] : memref<30x8x128xf32, #tpu.memory_space<vmem>>, vector<1x8x128xf32>
    %29 = vector.shape_cast %28 : vector<1x8x128xf32> to vector<8x128xf32>
    %c4_22 = arith.constant 4 : index
    %c0_23 = arith.constant 0 : index
    %c0_24 = arith.constant 0 : index
    %30 = vector.load %arg2[%c4_22, %c0_23, %c0_24] : memref<30x8x128xf32, #tpu.memory_space<vmem>>, vector<1x8x128xf32>
    %31 = vector.shape_cast %30 : vector<1x8x128xf32> to vector<8x128xf32>
    %c5 = arith.constant 5 : index
    %c0_25 = arith.constant 0 : index
    %c0_26 = arith.constant 0 : index
    %32 = vector.load %arg2[%c5, %c0_25, %c0_26] : memref<30x8x128xf32, #tpu.memory_space<vmem>>, vector<1x8x128xf32>
    %33 = vector.shape_cast %32 : vector<1x8x128xf32> to vector<8x128xf32>
    %c6 = arith.constant 6 : index
    %c0_27 = arith.constant 0 : index
    %c0_28 = arith.constant 0 : index
    %34 = vector.load %arg2[%c6, %c0_27, %c0_28] : memref<30x8x128xf32, #tpu.memory_space<vmem>>, vector<1x8x128xf32>
    %35 = vector.shape_cast %34 : vector<1x8x128xf32> to vector<8x128xf32>
    %c7 = arith.constant 7 : index
    %c0_29 = arith.constant 0 : index
    %c0_30 = arith.constant 0 : index
    %36 = vector.load %arg2[%c7, %c0_29, %c0_30] : memref<30x8x128xf32, #tpu.memory_space<vmem>>, vector<1x8x128xf32>
    %37 = vector.shape_cast %36 : vector<1x8x128xf32> to vector<8x128xf32>
    %c8 = arith.constant 8 : index
    %c0_31 = arith.constant 0 : index
    %c0_32 = arith.constant 0 : index
    %38 = vector.load %arg2[%c8, %c0_31, %c0_32] : memref<30x8x128xf32, #tpu.memory_space<vmem>>, vector<1x8x128xf32>
    %39 = vector.shape_cast %38 : vector<1x8x128xf32> to vector<8x128xf32>
    %c9 = arith.constant 9 : index
    %c0_33 = arith.constant 0 : index
    %c0_34 = arith.constant 0 : index
    %40 = vector.load %arg2[%c9, %c0_33, %c0_34] : memref<30x8x128xf32, #tpu.memory_space<vmem>>, vector<1x8x128xf32>
    %41 = vector.shape_cast %40 : vector<1x8x128xf32> to vector<8x128xf32>
    %c0_35 = arith.constant 0 : index
    %c0_36 = arith.constant 0 : index
    %c0_37 = arith.constant 0 : index
    %42 = vector.load %arg3[%c0_35, %c0_36, %c0_37] : memref<30x8x128xf32, #tpu.memory_space<vmem>>, vector<1x8x128xf32>
    %43 = vector.shape_cast %42 : vector<1x8x128xf32> to vector<8x128xf32>
    %c1_38 = arith.constant 1 : index
    %c0_39 = arith.constant 0 : index
    %c0_40 = arith.constant 0 : index
    %44 = vector.load %arg3[%c1_38, %c0_39, %c0_40] : memref<30x8x128xf32, #tpu.memory_space<vmem>>, vector<1x8x128xf32>
    %45 = vector.shape_cast %44 : vector<1x8x128xf32> to vector<8x128xf32>
    %c2_41 = arith.constant 2 : index
    %c0_42 = arith.constant 0 : index
    %c0_43 = arith.constant 0 : index
    %46 = vector.load %arg3[%c2_41, %c0_42, %c0_43] : memref<30x8x128xf32, #tpu.memory_space<vmem>>, vector<1x8x128xf32>
    %47 = vector.shape_cast %46 : vector<1x8x128xf32> to vector<8x128xf32>
    %c3_44 = arith.constant 3 : index
    %c0_45 = arith.constant 0 : index
    %c0_46 = arith.constant 0 : index
    %48 = vector.load %arg3[%c3_44, %c0_45, %c0_46] : memref<30x8x128xf32, #tpu.memory_space<vmem>>, vector<1x8x128xf32>
    %49 = vector.shape_cast %48 : vector<1x8x128xf32> to vector<8x128xf32>
    %c5_47 = arith.constant 5 : index
    %c0_48 = arith.constant 0 : index
    %c0_49 = arith.constant 0 : index
    %50 = vector.load %arg3[%c5_47, %c0_48, %c0_49] : memref<30x8x128xf32, #tpu.memory_space<vmem>>, vector<1x8x128xf32>
    %51 = vector.shape_cast %50 : vector<1x8x128xf32> to vector<8x128xf32>
    %c6_50 = arith.constant 6 : index
    %c0_51 = arith.constant 0 : index
    %c0_52 = arith.constant 0 : index
    %52 = vector.load %arg3[%c6_50, %c0_51, %c0_52] : memref<30x8x128xf32, #tpu.memory_space<vmem>>, vector<1x8x128xf32>
    %53 = vector.shape_cast %52 : vector<1x8x128xf32> to vector<8x128xf32>
    %c7_53 = arith.constant 7 : index
    %c0_54 = arith.constant 0 : index
    %c0_55 = arith.constant 0 : index
    %54 = vector.load %arg3[%c7_53, %c0_54, %c0_55] : memref<30x8x128xf32, #tpu.memory_space<vmem>>, vector<1x8x128xf32>
    %55 = vector.shape_cast %54 : vector<1x8x128xf32> to vector<8x128xf32>
    %c8_56 = arith.constant 8 : index
    %c0_57 = arith.constant 0 : index
    %c0_58 = arith.constant 0 : index
    %56 = vector.load %arg3[%c8_56, %c0_57, %c0_58] : memref<30x8x128xf32, #tpu.memory_space<vmem>>, vector<1x8x128xf32>
    %57 = vector.shape_cast %56 : vector<1x8x128xf32> to vector<8x128xf32>
    %c9_59 = arith.constant 9 : index
    %c0_60 = arith.constant 0 : index
    %c0_61 = arith.constant 0 : index
    %58 = vector.load %arg3[%c9_59, %c0_60, %c0_61] : memref<30x8x128xf32, #tpu.memory_space<vmem>>, vector<1x8x128xf32>
    %59 = vector.shape_cast %58 : vector<1x8x128xf32> to vector<8x128xf32>
    %60 = arith.subf %31, %4 : vector<8x128xf32>
    %61 = arith.subf %41, %59 : vector<8x128xf32>
    %c0_62 = arith.constant 0 : index
    %c0_63 = arith.constant 0 : index
    %62 = vector.load %arg8[%c0_62, %c0_63] : memref<8x128xf32, #tpu.memory_space<vmem>>, vector<8x128xf32>
    %63 = arith.mulf %60, %60 : vector<8x128xf32>
    %64 = arith.mulf %61, %61 : vector<8x128xf32>
    %65 = arith.addf %63, %64 : vector<8x128xf32>
    %66 = arith.mulf %12, %65 : vector<8x128xf32>
    %67 = arith.addf %62, %66 : vector<8x128xf32>
    %c0_64 = arith.constant 0 : index
    %c0_65 = arith.constant 0 : index
    %68 = vector.load %arg8[%c0_64, %c0_65] : memref<8x128xf32, #tpu.memory_space<vmem>>, vector<8x128xf32>
    tpu.vector_store %arg8[%c0_64, %c0_65], %67 {strides = array<i32>} : memref<8x128xf32, #tpu.memory_space<vmem>>, vector<8x128xf32>,
    %cst_66 = arith.constant 1.250000e-01 : f32
    %69 = vector.broadcast %cst_66 : f32 to vector<8x128xf32>
    %70 = arith.mulf %43, %69 : vector<8x128xf32>
    %cst_67 = arith.constant 1.250000e-01 : f32
    %71 = vector.broadcast %cst_67 : f32 to vector<8x128xf32>
    %72 = arith.mulf %45, %71 : vector<8x128xf32>
    %cst_68 = arith.constant 5.000000e-01 : f32
    %73 = vector.broadcast %cst_68 : f32 to vector<8x128xf32>
    %74 = arith.mulf %73, %47 : vector<8x128xf32>
    %cst_69 = arith.constant 5.000000e-01 : f32
    %75 = vector.broadcast %cst_69 : f32 to vector<8x128xf32>
    %76 = arith.mulf %75, %49 : vector<8x128xf32>
    %77 = arith.subf %70, %74 : vector<8x128xf32>
    %78 = arith.subf %72, %76 : vector<8x128xf32>
    %79 = arith.addf %70, %74 : vector<8x128xf32>
    %80 = arith.addf %72, %76 : vector<8x128xf32>
    %81 = arith.subf %79, %77 : vector<8x128xf32>
    %82 = arith.subf %80, %78 : vector<8x128xf32>
    %83 = arith.mulf %81, %82 : vector<8x128xf32>
    %cst_70 = arith.constant 1.250000e-01 : f32
    %84 = vector.broadcast %cst_70 : f32 to vector<8x128xf32>
    %85 = arith.mulf %23, %84 : vector<8x128xf32>
    %cst_71 = arith.constant 1.250000e-01 : f32
    %86 = vector.broadcast %cst_71 : f32 to vector<8x128xf32>
    %87 = arith.mulf %25, %86 : vector<8x128xf32>
    %cst_72 = arith.constant 5.000000e-01 : f32
    %88 = vector.broadcast %cst_72 : f32 to vector<8x128xf32>
    %89 = arith.mulf %88, %27 : vector<8x128xf32>
    %cst_73 = arith.constant 5.000000e-01 : f32
    %90 = vector.broadcast %cst_73 : f32 to vector<8x128xf32>
    %91 = arith.mulf %90, %29 : vector<8x128xf32>
    %92 = arith.subf %85, %89 : vector<8x128xf32>
    %93 = arith.subf %87, %91 : vector<8x128xf32>
    %94 = arith.addf %85, %89 : vector<8x128xf32>
    %95 = arith.addf %87, %91 : vector<8x128xf32>
    %96 = arith.minimumf %94, %79 : vector<8x128xf32>
    %97 = arith.maximumf %92, %77 : vector<8x128xf32>
    %98 = arith.subf %96, %97 : vector<8x128xf32>
    %cst_74 = arith.constant 0.000000e+00 : f32
    %99 = vector.broadcast %cst_74 : f32 to vector<8x128xf32>
    %100 = arith.maximumf %98, %99 : vector<8x128xf32>
    %101 = arith.minimumf %95, %80 : vector<8x128xf32>
    %102 = arith.maximumf %93, %78 : vector<8x128xf32>
    %103 = arith.subf %101, %102 : vector<8x128xf32>
    %cst_75 = arith.constant 0.000000e+00 : f32
    %104 = vector.broadcast %cst_75 : f32 to vector<8x128xf32>
    %105 = arith.maximumf %103, %104 : vector<8x128xf32>
    %106 = arith.mulf %100, %105 : vector<8x128xf32>
    %107 = arith.subf %94, %92 : vector<8x128xf32>
    %108 = arith.subf %95, %93 : vector<8x128xf32>
    %109 = arith.mulf %107, %108 : vector<8x128xf32>
    %110 = arith.addf %109, %83 : vector<8x128xf32>
    %111 = arith.subf %110, %106 : vector<8x128xf32>
    %cst_76 = arith.constant 0.000000e+00 : f32
    %112 = vector.broadcast %cst_76 : f32 to vector<8x128xf32>
    %113 = arith.cmpf one, %111, %112 : vector<8x128xf32>
    %114 = arith.divf %106, %111 : vector<8x128xf32>
    %cst_77 = arith.constant 0.000000e+00 : f32
    %115 = vector.broadcast %cst_77 : f32 to vector<8x128xf32>
    %116 = arith.select %113, %114, %115 : vector<8x128xi1>, vector<8x128xf32>
    %cst_78 = arith.constant 1.250000e-01 : f32
    %117 = vector.broadcast %cst_78 : f32 to vector<8x128xf32>
    %118 = arith.mulf %33, %117 : vector<8x128xf32>
    %cst_79 = arith.constant 1.250000e-01 : f32
    %119 = vector.broadcast %cst_79 : f32 to vector<8x128xf32>
    %120 = arith.mulf %35, %119 : vector<8x128xf32>
    %cst_80 = arith.constant 5.000000e-01 : f32
    %121 = vector.broadcast %cst_80 : f32 to vector<8x128xf32>
    %122 = arith.mulf %121, %37 : vector<8x128xf32>
    %cst_81 = arith.constant 5.000000e-01 : f32
    %123 = vector.broadcast %cst_81 : f32 to vector<8x128xf32>
    %124 = arith.mulf %123, %39 : vector<8x128xf32>
    %125 = arith.subf %118, %122 : vector<8x128xf32>
    %126 = arith.subf %120, %124 : vector<8x128xf32>
    %127 = arith.addf %118, %122 : vector<8x128xf32>
    %128 = arith.addf %120, %124 : vector<8x128xf32>
    %129 = arith.minimumf %127, %79 : vector<8x128xf32>
    %130 = arith.maximumf %125, %77 : vector<8x128xf32>
    %131 = arith.subf %129, %130 : vector<8x128xf32>
    %cst_82 = arith.constant 0.000000e+00 : f32
    %132 = vector.broadcast %cst_82 : f32 to vector<8x128xf32>
    %133 = arith.maximumf %131, %132 : vector<8x128xf32>
    %134 = arith.minimumf %128, %80 : vector<8x128xf32>
    %135 = arith.maximumf %126, %78 : vector<8x128xf32>
    %136 = arith.subf %134, %135 : vector<8x128xf32>
    %cst_83 = arith.constant 0.000000e+00 : f32
    %137 = vector.broadcast %cst_83 : f32 to vector<8x128xf32>
    %138 = arith.maximumf %136, %137 : vector<8x128xf32>
    %139 = arith.mulf %133, %138 : vector<8x128xf32>
    %140 = arith.subf %127, %125 : vector<8x128xf32>
    %141 = arith.subf %128, %126 : vector<8x128xf32>
    %142 = arith.mulf %140, %141 : vector<8x128xf32>
    %143 = arith.addf %142, %83 : vector<8x128xf32>
    %144 = arith.subf %143, %139 : vector<8x128xf32>
    %cst_84 = arith.constant 0.000000e+00 : f32
    %145 = vector.broadcast %cst_84 : f32 to vector<8x128xf32>
    %146 = arith.cmpf one, %144, %145 : vector<8x128xf32>
    %147 = arith.divf %139, %144 : vector<8x128xf32>
    %cst_85 = arith.constant 0.000000e+00 : f32
    %148 = vector.broadcast %cst_85 : f32 to vector<8x128xf32>
    %149 = arith.select %146, %147, %148 : vector<8x128xi1>, vector<8x128xf32>
    %150 = arith.cmpf ogt, %149, %116 : vector<8x128xf32>
    %151 = arith.maximumf %116, %149 : vector<8x128xf32>
    %152 = arith.select %150, %33, %23 : vector<8x128xi1>, vector<8x128xf32>
    %153 = arith.select %150, %35, %25 : vector<8x128xi1>, vector<8x128xf32>
    %154 = arith.select %150, %37, %27 : vector<8x128xi1>, vector<8x128xf32>
    %155 = arith.select %150, %39, %29 : vector<8x128xi1>, vector<8x128xf32>
    %156 = arith.select %150, %41, %31 : vector<8x128xi1>, vector<8x128xf32>
    %157 = arith.select %150, %51, %43 : vector<8x128xi1>, vector<8x128xf32>
    %158 = arith.select %150, %53, %45 : vector<8x128xi1>, vector<8x128xf32>
    %159 = arith.select %150, %55, %47 : vector<8x128xi1>, vector<8x128xf32>
    %160 = arith.select %150, %57, %49 : vector<8x128xi1>, vector<8x128xf32>
    %161 = arith.subf %152, %157 : vector<8x128xf32>
    %162 = arith.subf %153, %158 : vector<8x128xf32>
    %cst_86 = arith.constant 1.000000e+00 : f32
    %163 = vector.broadcast %cst_86 : f32 to vector<8x128xf32>
    %164 = arith.select %6, %154, %163 : vector<8x128xi1>, vector<8x128xf32>
    %cst_87 = arith.constant 1.000000e+00 : f32
    %165 = vector.broadcast %cst_87 : f32 to vector<8x128xf32>
    %166 = arith.select %6, %155, %165 : vector<8x128xi1>, vector<8x128xf32>
    %cst_88 = arith.constant 1.000000e+00 : f32
    %167 = vector.broadcast %cst_88 : f32 to vector<8x128xf32>
    %168 = arith.select %6, %159, %167 : vector<8x128xi1>, vector<8x128xf32>
    %cst_89 = arith.constant 1.000000e+00 : f32
    %169 = vector.broadcast %cst_89 : f32 to vector<8x128xf32>
    %170 = arith.select %6, %160, %169 : vector<8x128xi1>, vector<8x128xf32>
    %171 = math.sqrt %164 : vector<8x128xf32>
    %172 = math.sqrt %168 : vector<8x128xf32>
    %173 = arith.subf %171, %172 : vector<8x128xf32>
    %174 = math.sqrt %166 : vector<8x128xf32>
    %175 = math.sqrt %170 : vector<8x128xf32>
    %176 = arith.subf %174, %175 : vector<8x128xf32>
    %c0_90 = arith.constant 0 : index
    %c0_91 = arith.constant 0 : index
    %177 = vector.load %arg6[%c0_90, %c0_91] : memref<8x128xf32, #tpu.memory_space<vmem>>, vector<8x128xf32>
    %178 = arith.mulf %161, %161 : vector<8x128xf32>
    %179 = arith.mulf %162, %162 : vector<8x128xf32>
    %180 = arith.addf %178, %179 : vector<8x128xf32>
    %181 = arith.mulf %173, %173 : vector<8x128xf32>
    %182 = arith.addf %180, %181 : vector<8x128xf32>
    %183 = arith.mulf %176, %176 : vector<8x128xf32>
    %184 = arith.addf %182, %183 : vector<8x128xf32>
    %185 = arith.mulf %8, %184 : vector<8x128xf32>
    %186 = arith.addf %177, %185 : vector<8x128xf32>
    %c0_92 = arith.constant 0 : index
    %c0_93 = arith.constant 0 : index
    %187 = vector.load %arg6[%c0_92, %c0_93] : memref<8x128xf32, #tpu.memory_space<vmem>>, vector<8x128xf32>
    tpu.vector_store %arg6[%c0_92, %c0_93], %186 {strides = array<i32>} : memref<8x128xf32, #tpu.memory_space<vmem>>, vector<8x128xf32>,
    %188 = arith.subf %156, %151 : vector<8x128xf32>
    %c0_94 = arith.constant 0 : index
    %c0_95 = arith.constant 0 : index
    %189 = vector.load %arg7[%c0_94, %c0_95] : memref<8x128xf32, #tpu.memory_space<vmem>>, vector<8x128xf32>
    %190 = arith.mulf %188, %188 : vector<8x128xf32>
    %191 = arith.mulf %8, %190 : vector<8x128xf32>
    %192 = arith.addf %189, %191 : vector<8x128xf32>
    %c0_96 = arith.constant 0 : index
    %c0_97 = arith.constant 0 : index
    %193 = vector.load %arg7[%c0_96, %c0_97] : memref<8x128xf32, #tpu.memory_space<vmem>>, vector<8x128xf32>
    tpu.vector_store %arg7[%c0_96, %c0_97], %192 {strides = array<i32>} : memref<8x128xf32, #tpu.memory_space<vmem>>, vector<8x128xf32>,
    %c0_i32_98 = arith.constant 0 : i32
    %194 = arith.cmpi eq, %arg1, %c0_i32_98 : i32
    %195 = arith.extui %194 : i1 to i32
    %c0_i32_99 = arith.constant 0 : i32
    %196 = arith.cmpi ne, %195, %c0_i32_99 : i32
    scf.if %196 {
      %c0_100 = arith.constant 0 : index
      %c0_101 = arith.constant 0 : index
      %197 = vector.load %arg5[%c0_100, %c0_101] : memref<8x128xf32, #tpu.memory_space<vmem>>, vector<8x128xf32>
      %198 = vector.shape_cast %197 : vector<8x128xf32> to vector<1x8x128xf32>
      %cst_102 = arith.constant dense<0.000000e+00> : vector<1xf32>
      %199 = vector.multi_reduction <add>, %198, %cst_102 [1, 2] : vector<1x8x128xf32> to vector<1xf32>
      %200 = vector.shape_cast %199 : vector<1xf32> to vector<1x1x1xf32>
      %201 = vector.extract %200[0, 0, 0] : f32 from vector<1x1x1xf32>
      %c0_103 = arith.constant 0 : index
      %c0_104 = arith.constant 0 : index
      %202 = vector.load %arg6[%c0_103, %c0_104] : memref<8x128xf32, #tpu.memory_space<vmem>>, vector<8x128xf32>
      %203 = vector.shape_cast %202 : vector<8x128xf32> to vector<1x8x128xf32>
      %cst_105 = arith.constant dense<0.000000e+00> : vector<1xf32>
      %204 = vector.multi_reduction <add>, %203, %cst_105 [1, 2] : vector<1x8x128xf32> to vector<1xf32>
      %205 = vector.shape_cast %204 : vector<1xf32> to vector<1x1x1xf32>
      %206 = vector.extract %205[0, 0, 0] : f32 from vector<1x1x1xf32>
      %c0_106 = arith.constant 0 : index
      %c0_107 = arith.constant 0 : index
      %207 = vector.load %arg7[%c0_106, %c0_107] : memref<8x128xf32, #tpu.memory_space<vmem>>, vector<8x128xf32>
      %208 = vector.shape_cast %207 : vector<8x128xf32> to vector<1x8x128xf32>
      %cst_108 = arith.constant dense<0.000000e+00> : vector<1xf32>
      %209 = vector.multi_reduction <add>, %208, %cst_108 [1, 2] : vector<1x8x128xf32> to vector<1xf32>
      %210 = vector.shape_cast %209 : vector<1xf32> to vector<1x1x1xf32>
      %211 = vector.extract %210[0, 0, 0] : f32 from vector<1x1x1xf32>
      %c0_109 = arith.constant 0 : index
      %c0_110 = arith.constant 0 : index
      %212 = vector.load %arg8[%c0_109, %c0_110] : memref<8x128xf32, #tpu.memory_space<vmem>>, vector<8x128xf32>
      %213 = vector.shape_cast %212 : vector<8x128xf32> to vector<1x8x128xf32>
      %cst_111 = arith.constant dense<0.000000e+00> : vector<1xf32>
      %214 = vector.multi_reduction <add>, %213, %cst_111 [1, 2] : vector<1x8x128xf32> to vector<1xf32>
      %215 = vector.shape_cast %214 : vector<1xf32> to vector<1x1x1xf32>
      %216 = vector.extract %215[0, 0, 0] : f32 from vector<1x1x1xf32>
      %217 = tpu.iota {dimensions = array<i32: 0>} : vector<8x128xi32>
      %c0_i32_112 = arith.constant 0 : i32
      %218 = vector.broadcast %c0_i32_112 : i32 to vector<8x128xi32>
      %219 = arith.cmpi eq, %217, %218 : vector<8x128xi32>
      %c1_i32 = arith.constant 1 : i32
      %220 = vector.broadcast %c1_i32 : i32 to vector<8x128xi32>
      %221 = arith.cmpi eq, %217, %220 : vector<8x128xi32>
      %c2_i32 = arith.constant 2 : i32
      %222 = vector.broadcast %c2_i32 : i32 to vector<8x128xi32>
      %223 = arith.cmpi eq, %217, %222 : vector<8x128xi32>
      %224 = vector.broadcast %211 : f32 to vector<8x128xf32>
      %225 = vector.broadcast %216 : f32 to vector<8x128xf32>
      %226 = arith.select %223, %224, %225 : vector<8x128xi1>, vector<8x128xf32>
      %227 = vector.broadcast %206 : f32 to vector<8x128xf32>
      %228 = arith.select %221, %227, %226 : vector<8x128xi1>, vector<8x128xf32>
      %229 = vector.broadcast %201 : f32 to vector<8x128xf32>
      %230 = arith.select %219, %229, %228 : vector<8x128xi1>, vector<8x128xf32>
      %c0_113 = arith.constant 0 : index
      %c0_114 = arith.constant 0 : index
      %c0_115 = arith.constant 0 : index
      %231 = vector.load %arg4[%c0_113, %c0_114, %c0_115] : memref<1x8x128xf32, #tpu.memory_space<vmem>>, vector<1x8x128xf32>
      %232 = vector.shape_cast %231 : vector<1x8x128xf32> to vector<8x128xf32>
      %233 = vector.shape_cast %230 : vector<8x128xf32> to vector<1x8x128xf32>
      tpu.vector_store %arg4[%c0_113, %c0_114, %c0_115], %233 {strides = array<i32>} : memref<1x8x128xf32, #tpu.memory_space<vmem>>, vector<1x8x128xf32>,
    } else {
    }
    return
  }
  func.func @transform_0(%arg0: i32, %arg1: i32) -> (i32, i32, i32) {
    %c1_i32 = arith.constant 1 : i32
    %0 = arith.muli %arg0, %c1_i32 : i32
    %1 = arith.addi %0, %arg1 : i32
    %c0_i32 = arith.constant 0 : i32
    %c0_i32_0 = arith.constant 0 : i32
    %c0_i32_1 = arith.constant 0 : i32
    return %c0_i32, %1, %c0_i32_0 : i32, i32, i32
  }
  func.func @transform_1(%arg0: i32, %arg1: i32) -> (i32, i32, i32) {
    %c1_i32 = arith.constant 1 : i32
    %0 = arith.muli %arg0, %c1_i32 : i32
    %1 = arith.addi %0, %arg1 : i32
    %c0_i32 = arith.constant 0 : i32
    %c0_i32_0 = arith.constant 0 : i32
    %c0_i32_1 = arith.constant 0 : i32
    return %c0_i32, %1, %c0_i32_0 : i32, i32, i32
  }
  func.func @transform_2(%arg0: i32, %arg1: i32) -> (i32, i32, i32) {
    %c0_i32 = arith.constant 0 : i32
    %c0_i32_0 = arith.constant 0 : i32
    %c0_i32_1 = arith.constant 0 : i32
    return %arg0, %c0_i32, %c0_i32_0 : i32, i32, i32
  }
}

</mosaic_0001>

<bundles_post_ra>
// kernel: tpu_custom_call.1
= control target key start
LH: loop header
LB: loop body
LE: loop exit
PB: predicated region body
PF: predicated region fallthrough
CT: control target
= control target key end

     0   :  { %7 = vsyncpa [#allocation7], 0  ;;  %s711_s0 = inlined_call_operand.hbm [shape: f32[30,8,128], index: 0, kind: input, shape index: {}]   ;;  %s712_s1 = inlined_call_operand.hbm [shape: f32[30,8,128], index: 1, kind: input, shape index: {}]   ;;  %s713_s2 = inlined_call_operand.hbm [shape: f32[1,8,128], index: 2, kind: output, shape index: {}]  }
   0x1   :  { %8 = vsyncpa [#allocation10], 0 }
   0x2   :  { %9 = vsyncpa [#allocation8], 0  ;;  %s513_s9 = smov [#allocation6]   ;;  %s441_s13 = scalar_lea.hbm %s711_s0, 3840 }
   0x3   :  { %s18_s10 = sshll.u32 %s513_s9, 4  ;;  %p442_p0 = scmp.ne.s32.totalorder %s711_s0, %s441_s13  ;;  %s19_s10 = int_to_ptr.vmem [resolvable:$true] %s18_s10 }
   0x4   :  { %p445_p1 = scmp.lt.u32.totalorder %s441_s13, %s711_s0 }
   0x6   :  { %p447_p2 = pnand %p445_p1, %p442_p0 }
   0x8   :  { %450 = shalt.err (!%p447_p2)
}
   0x9   :  { %s451_s18 = scalar_lea.vmem %s19_s10, 3840  ;;  %p456_p4 = scmp.lt.s32.totalorder %s19_s10, %s19_s10 }
   0xa   :  { %p452_p3 = scmp.ne.s32.totalorder %s19_s10, %s451_s18  ;;  %p457_p5 = scmp.lt.s32.totalorder %s451_s18, %s451_s18 }
   0xc   :  { %p458_p6 = por %p457_p5, %p456_p4 }
   0xe   :  { %p459_p7 = pnand %p458_p6, %p452_p3 }
  0x10   :  { %462 = shalt.err (!%p459_p7)
}
  0x11   :  { %s514_s19 = smov 128   ;;  %s515_s20 = smov 8  }
  0x12   :  { %24 = dma.hbm_to_vmem [thread:$0]  %s711_s0, 3840, %s19_s10, [#allocation7], %s514_s19, %s514_s19, %s515_s20  }
  0x13   :  { %s516_s23 = smov [#allocation9]   ;;  %s463_s27 = scalar_lea.hbm %s712_s1, 3840 }
  0x14   :  { %s33_s24 = sshll.u32 %s516_s23, 4  ;;  %p464_p8 = scmp.ne.s32.totalorder %s712_s1, %s463_s27  ;;  %s34_s24 = int_to_ptr.vmem [resolvable:$true] %s33_s24 }
  0x15   :  { %p467_p9 = scmp.lt.u32.totalorder %s463_s27, %s712_s1 }
  0x17   :  { %p469_p10 = pnand %p467_p9, %p464_p8 }
  0x19   :  { %472 = shalt.err (!%p469_p10)
}
  0x1a   :  { %s473_s4 = scalar_lea.vmem %s34_s24, 3840  ;;  %p478_p12 = scmp.lt.s32.totalorder %s34_s24, %s34_s24 }
  0x1b   :  { %p474_p11 = scmp.ne.s32.totalorder %s34_s24, %s473_s4  ;;  %p479_p13 = scmp.lt.s32.totalorder %s473_s4, %s473_s4 }
  0x1d   :  { %p480_p0 = por %p479_p13, %p478_p12 }
  0x1f   :  { %p481_p1 = pnand %p480_p0, %p474_p11 }
  0x21   :  { %484 = shalt.err (!%p481_p1)
}
  0x22   :  { %39 = dma.hbm_to_vmem [thread:$0]  %s712_s1, 3840, %s34_s24, [#allocation10], %s514_s19, %s514_s19, %s515_s20  }
  0x23   :  { %507 = dma.done.wait [#allocation7], 3840  }
  0x24   :  { %508 = vsyncadd [#allocation7], 4294963456 }
  0x25   :  { %509 = dma.done.wait [#allocation10], 3840  }
  0x26   :  { %510 = vsyncadd [#allocation10], 4294963456  ;;  %v558_v0 = vld [vmem:[#allocation6] sm:$0xff]  ;;  %v560_v1 = vld [vmem:[#allocation6 + $0x8] sm:$0xff]  ;;  %s518_s9 = smov [#allocation11]  }
  0x27   :  { %v562_v2 = vld [vmem:[#allocation6 + $0x10] sm:$0xff]  ;;  %v564_v3 = vld [vmem:[#allocation6 + $0x18] sm:$0xff]  ;;  %v225_v4 = vmul.f32 0.125, %v558_v0  ;;  %v226_v5 = vmul.f32 0.125, %v560_v1  ;;  %v568_v6 = vld [vmem:[#allocation6 + $0x28] sm:$0xff]  ;;  %s403_s10 = sshll.u32 %s518_s9, 4  ;;  %s404_s10 = int_to_ptr.vmem [resolvable:$true] %s403_s10 }
  0x28   :  { %v570_v7 = vld [vmem:[#allocation6 + $0x30] sm:$0xff]  ;;  %v572_v8 = vld [vmem:[#allocation6 + $0x38] sm:$0xff]  ;;  %v227_v9 = vmul.f32 0.5, %v562_v2  ;;  %v228_v10 = vmul.f32 0.5, %v564_v3  ;;  %v576_v11 = vld [vmem:[#allocation6 + $0x40] sm:$0xff]  ;;  %v251_v13 = vmul.f32 0.125, %v568_v6  ;;  %p490_p3 = scmp.lt.s32.totalorder %s404_s10, %s404_s10 }
  0x29   :  { %v578_v12 = vld [vmem:[#allocation9] sm:$0xff]  ;;  %v252_v14 = vmul.f32 0.125, %v570_v7  ;;  %v253_v15 = vmul.f32 0.5, %v572_v8  ;;  %v583_v16 = vld [vmem:[#allocation9 + $0x8] sm:$0xff]  ;;  %v585_v17 = vld [vmem:[#allocation9 + $0x10] sm:$0xff]  ;;  %v254_v28 = vmul.f32 0.5, %v576_v11 }
  0x2a   :  { %v587_v18 = vld [vmem:[#allocation9 + $0x18] sm:$0xff]  ;;  %v214_v19 = vmul.f32 0.125, %v578_v12  ;;  %v229_v20 = vsub.f32 %v225_v4, %v227_v9  ;;  %v230_v21 = vsub.f32 %v226_v5, %v228_v10  ;;  %v231_v22 = vadd.f32 %v227_v9, %v225_v4  ;;  %v65_v61 = vld [vmem:[#allocation6 + $0x50] sm:$0xff]  ;;  %v86_v9 = vld [vmem:[#allocation9 + $0x50] sm:$0xff]  ;;  %s485_s11 = scalar_lea.vmem %s404_s10, 128 }
  0x2b   :  { %v215_v23 = vmul.f32 0.125, %v583_v16  ;;  %v216_v24 = vmul.f32 0.5, %v585_v17  ;;  %v217_v25 = vmul.f32 0.5, %v587_v18  ;;  %v232_v26 = vadd.f32 %v228_v10, %v226_v5  ;;  %v66_v5 = vld [vmem:[#allocation6 + $0x58] sm:$0xff]  ;;  %v87_v10 = vld [vmem:[#allocation9 + $0x58] sm:$0xff]  ;;  %p486_p2 = scmp.ne.s32.totalorder %s404_s10, %s485_s11  ;;  %p491_p4 = scmp.lt.s32.totalorder %s485_s11, %s485_s11 }
  0x2c   :  { %v242_v27 = vsub.f32 %v231_v22, %v229_v20  ;;  %v255_v29 = vsub.f32 %v251_v13, %v253_v15  ;;  %v257_v30 = vadd.f32 %v253_v15, %v251_v13  ;;  %v256_v36 = vsub.f32 %v252_v14, %v254_v28  ;;  %v67_v15 = vld [vmem:[#allocation6 + $0x60] sm:$0xff] }
  0x2d   :  { %v218_v31 = vsub.f32 %v214_v19, %v216_v24  ;;  %v219_v32 = vsub.f32 %v215_v23, %v217_v25  ;;  %v220_v33 = vadd.f32 %v216_v24, %v214_v19  ;;  %v221_v34 = vadd.f32 %v217_v25, %v215_v23  ;;  %v88_v19 = vld [vmem:[#allocation9 + $0x60] sm:$0xff]  ;;  %v68_v23 = vld [vmem:[#allocation6 + $0x68] sm:$0xff]  ;;  %v89_v24 = vld [vmem:[#allocation9 + $0x68] sm:$0xff]  ;;  %p492_p5 = por %p491_p4, %p490_p3 }
  0x2e   :  { %v243_v35 = vsub.f32 %v232_v26, %v230_v21  ;;  %v258_v37 = vadd.f32 %v254_v28, %v252_v14  ;;  %v268_v38 = vsub.f32 %v257_v30, %v255_v29  ;;  %v108_v25 = vsub.f32 %v67_v15, %v88_v19  ;;  %v200_v19 = vld [vmem:[#allocation9 + $0x38] sm:$0xff] }
  0x2f   :  { %v222_v39 = vsub.f32 %v220_v33, %v218_v31  ;;  %v223_v40 = vsub.f32 %v221_v34, %v219_v32  ;;  %v233_v41 = vmin.f32 %v231_v22, %v220_v33  ;;  %v234_v42 = vmax.f32 %v229_v20, %v218_v31  ;;  %p493_p6 = pnand %p492_p5, %p486_p2 }
  0x30   :  { %v237_v43 = vmin.f32 %v232_v26, %v221_v34  ;;  %v238_v44 = vmax.f32 %v230_v21, %v219_v32  ;;  %v244_v45 = vmul.f32 %v243_v35, %v242_v27  ;;  %v259_v46 = vmin.f32 %v257_v30, %v220_v33  ;;  %v69_v26 = vld [vmem:[#allocation6 + $0x70] sm:$0xff]  ;;  %v90_v27 = vld [vmem:[#allocation9 + $0x70] sm:$0xff] }
  0x31   :  { %v224_v47 = vmul.f32 %v223_v40, %v222_v39  ;;  %v235_v48 = vsub.f32 %v233_v41, %v234_v42  ;;  %v260_v49 = vmax.f32 %v255_v29, %v218_v31  ;;  %v263_v50 = vmin.f32 %v258_v37, %v221_v34  ;;  %v70_v31 = vld [vmem:[#allocation6 + $0x78] sm:$0xff]  ;;  %v71_v35 = vld [vmem:[#allocation6 + $0x80] sm:$0xff]  ;;  %v73_v42 = vld [vmem:[#allocation6 + $0x90] sm:$0xff] }
  0x32   :  { %v239_v51 = vsub.f32 %v237_v43, %v238_v44  ;;  %v264_v52 = vmax.f32 %v256_v36, %v219_v32  ;;  %v269_v53 = vsub.f32 %v258_v37, %v256_v36  ;;  %v106_v20 = vsub.f32 %v65_v61, %v86_v9  ;;  %v91_v32 = vld [vmem:[#allocation9 + $0x78] sm:$0xff]  ;;  %v92_v37 = vld [vmem:[#allocation9 + $0x80] sm:$0xff]  ;;  %v94_v43 = vld [vmem:[#allocation9 + $0x90] sm:$0xff] }
  0x33   :  { %v236_v54 = vmax.f32 %v235_v48, 0.0  ;;  %v261_v55 = vsub.f32 %v259_v46, %v260_v49  ;;  %v245_v57 = vadd.f32 %v244_v45, %v224_v47  ;;  %v107_v21 = vsub.f32 %v66_v5, %v87_v10  ;;  %v72_v36 = vld [vmem:[#allocation6 + $0x88] sm:$0xff]  ;;  %v594_v44 = vld [vmem:[#allocation9 + $0x20] sm:$0xff]  ;;  %v177_v49 = vld [vmem:[#allocation6 + $0x20] sm:$0xff] }
  0x34   :  { %v240_v56 = vmax.f32 %v239_v51, 0.0  ;;  %v265_v58 = vsub.f32 %v263_v50, %v264_v52  ;;  %v270_v59 = vmul.f32 %v269_v53, %v268_v38  ;;  %v109_v28 = vsub.f32 %v68_v23, %v89_v24  ;;  %v93_v38 = vld [vmem:[#allocation9 + $0x88] sm:$0xff]  ;;  %v187_v50 = vld [vmem:[#allocation6 + $0x48] sm:$0xff]  ;;  %v202_v24 = vld [vmem:[#allocation9 + $0x40] sm:$0xff] }
  0x35   :  { %v262_v60 = vmax.f32 %v261_v55, 0.0  ;;  %v127_v29 = vmul.f32 %v106_v20, %v106_v20  ;;  %v128_v30 = vmul.f32 %v107_v21, %v107_v21  ;;  %v110_v33 = vsub.f32 %v69_v26, %v90_v27  ;;  %v74_v51 = vld [vmem:[#allocation6 + $0x98] sm:$0xff]  ;;  %v75_v55 = vld [vmem:[#allocation6 + $0xa0] sm:$0xff] }
  0x36   :  { %v241_v62 = vmul.f32 %v240_v56, %v236_v54  ;;  %v266_v63 = vmax.f32 %v265_v58, 0.0  ;;  %v271_v4 = vadd.f32 %v270_v59, %v224_v47  ;;  %v129_v34 = vmul.f32 %v108_v25, %v108_v25  ;;  %v204_v47 = vld [vmem:[#allocation9 + $0x48] sm:$0xff]  ;;  %v95_v56 = vld [vmem:[#allocation9 + $0x98] sm:$0xff] }
  0x37   :  { %v111_v39 = vsub.f32 %v70_v31, %v91_v32  ;;  %v130_v40 = vmul.f32 %v109_v28, %v109_v28  ;;  %v147_v41 = vadd.f32 %v128_v30, %v127_v29  ;;  %v131_v45 = vmul.f32 %v110_v33, %v110_v33 }
  0x38   :  { %v246_v13 = vsub.f32 %v245_v57, %v241_v62  ;;  %v267_v14 = vmul.f32 %v266_v63, %v262_v60  ;;  %v112_v52 = vsub.f32 %v71_v35, %v92_v37  ;;  %v113_v53 = vsub.f32 %v72_v36, %v93_v38  ;;  %v96_v57 = vld [vmem:[#allocation9 + $0xa0] sm:$0xff]  ;;  %v97_v36 = vld [vmem:[#allocation9 + $0xa8] sm:$0xff]  ;;  %v98_v37 = vld [vmem:[#allocation9 + $0xb0] sm:$0xff] }
  0x39   :  { %v148_v46 = vadd.f32 %v147_v41, %v129_v34  ;;  %v114_v58 = vsub.f32 %v73_v42, %v94_v43  ;;  %v132_v59 = vmul.f32 %v111_v39, %v111_v39  ;;  %vm58_vm1 = vcmp.gt.f32.partialorder %v594_v44, 0.0  ;;  %v77_v35 = vld [vmem:[#allocation6 + $0xb0] sm:$0xff]  ;;  %v79_v39 = vld [vmem:[#allocation6 + $0xc0] sm:$0xff]  ;;  %v80_v43 = vld [vmem:[#allocation6 + $0xc8] sm:$0xff] }
  0x3a   :  { %429 = vrcp.f32 %v246_v13  ;;  %v272_v22 = vsub.f32 %v271_v4, %v267_v14  ;;  %vm247_vm0 = vcmp.ne.f32.partialorder %v246_v13, 0.0  ;;  %v205_v63 = vsub.f32 %v177_v49, %v594_v44  ;;  %v76_v13 = vld [vmem:[#allocation6 + $0xa8] sm:$0xff]  ;;  %v100_v41 = vld [vmem:[#allocation9 + $0xc0] sm:$0xff] }
  0x3b   :  { %v149_v60 = vadd.f32 %v148_v46, %v130_v40  ;;  %v206_v4 = vsub.f32 %v187_v50, %v204_v47  ;;  %v517_v5 = vmov 0.0   ;;  %v115_v20 = vsub.f32 %v74_v51, %v95_v56  ;;  %v99_v40 = vld [vmem:[#allocation9 + $0xb8] sm:$0xff] }
  0x3c   :  { %431 = vrcp.f32 %v272_v22  ;;  %vm273_vm2 = vcmp.ne.f32.partialorder %v272_v22, 0.0  ;;  %v600_v9 = vsel %vm58_vm1, 1.0, %v517_v5  ;;  %v116_v21 = vsub.f32 %v75_v55, %v96_v57  ;;  %v102_v55 = vld [vmem:[#allocation9 + $0xd0] sm:$0xff] }
  0x3d   :  { %v150_v15 = vadd.f32 %v149_v60, %v131_v45  ;;  %v133_v23 = vmul.f32 %v112_v52, %v112_v52  ;;  %vm61_vm3 = vcmp.eq.f32.partialorder %v594_v44, 0.0  ;;  %v134_v25 = vmul.f32 %v113_v53, %v113_v53  ;;  %v101_v45 = vld [vmem:[#allocation9 + $0xc8] sm:$0xff]  ;;  %v198_v53 = vld [vmem:[#allocation9 + $0x30] sm:$0xff] }
  0x3e   :  { %v135_v26 = vmul.f32 %v114_v58, %v114_v58  ;;  %v208_v30 = vmul.f32 %v205_v63, %v205_v63  ;;  %v117_v46 = vsub.f32 %v76_v13, %v97_v36  ;;  %v118_v47 = vsub.f32 %v77_v35, %v98_v37  ;;  %v196_v52 = vld [vmem:[#allocation9 + $0x28] sm:$0xff] }
  0x3f   :  { %v151_v27 = vadd.f32 %v150_v15, %v132_v59  ;;  %v120_v57 = vsub.f32 %v79_v39, %v100_v41  ;;  %v414_v58 = vsel %vm61_vm3, 1.0, %v517_v5  ;;  %v82_v60 = vld [vmem:[#allocation6 + $0xd8] sm:$0xff]  ;;  %v121_v63 = vsub.f32 %v80_v43, %v101_v45  ;;  %v84_v39 = vld [vmem:[#allocation6 + $0xe8] sm:$0xff] }
  0x41   :  { %v152_v42 = vadd.f32 %v151_v27, %v133_v23 }
  0x44   :  { %v430_v48 = vpop.eup %429 }
  0x45   :  { %v249_v54 = vmul.f32 %v430_v48, %v241_v62  ;;  %v136_v48 = vmul.f32 %v115_v20, %v115_v20  ;;  %v138_v20 = vmul.f32 %v117_v46, %v117_v46 }
  0x46   :  { %v432_v61 = vpop.eup %431 }
  0x47   :  { %v250_v62 = vsel %vm247_vm0, %v249_v54, 0.0  ;;  %v275_v10 = vmul.f32 %v432_v61, %v267_v14  ;;  %v209_v14 = vmul.f32 %v206_v4, %v206_v4  ;;  %v81_v54 = vld [vmem:[#allocation6 + $0xd0] sm:$0xff]  ;;  %v103_v61 = vld [vmem:[#allocation9 + $0xd8] sm:$0xff]  ;;  %v137_v4 = vmul.f32 %v116_v21, %v116_v21 }
  0x49   :  { %v276_v22 = vsel %vm273_vm2, %v275_v10, 0.0  ;;  %v210_v51 = vadd.f32 %v209_v14, %v208_v30 }
  0x4a   :  { %vm604_vm4 = vcmp.gt.f32.partialorder %v276_v22, %v250_v62  ;;  %v278_v29 = vmax.f32 %v250_v62, %v276_v22  ;;  %v141_v22 = vmul.f32 %v120_v57, %v120_v57 }
  0x4b   :  { %v281_v31 = vsel %vm604_vm4, %v572_v8, %v562_v2  ;;  %v282_v32 = vsel %vm604_vm4, %v576_v11, %v564_v3  ;;  %v283_v33 = vsel %vm604_vm4, %v187_v50, %v177_v49  ;;  %v286_v34 = vsel %vm604_vm4, %v200_v19, %v585_v17  ;;  %v78_v11 = vld [vmem:[#allocation6 + $0xb8] sm:$0xff] }
  0x4c   :  { %v287_v38 = vsel %vm604_vm4, %v202_v24, %v587_v18  ;;  %v626_v2 = vsel %vm58_vm1, %v281_v31, 1.0  ;;  %v630_v3 = vsel %vm58_vm1, %v282_v32, 1.0  ;;  %v634_v8 = vsel %vm58_vm1, %v286_v34, 1.0  ;;  %v83_v31 = vld [vmem:[#allocation6 + $0xe0] sm:$0xff]  ;;  %v104_v32 = vld [vmem:[#allocation9 + $0xe0] sm:$0xff] }
  0x4d   :  { %v638_v17 = vsel %vm58_vm1, %v287_v38, 1.0  ;;  %433 = vrsqrt.f32 %v626_v2  ;;  %v335_v18 = vsub.f32 %v283_v33, %v278_v29  ;;  %v153_v50 = vadd.f32 %v152_v42, %v134_v25 }
  0x4e   :  { %435 = vrsqrt.f32 %v634_v8  ;;  %v119_v56 = vsub.f32 %v78_v11, %v99_v40  ;;  %v279_v10 = vsel %vm604_vm4, %v568_v6, %v558_v0  ;;  %v280_v15 = vsel %vm604_vm4, %v570_v7, %v560_v1  ;;  %v105_v40 = vld [vmem:[#allocation9 + $0xe8] sm:$0xff] }
  0x4f   :  { %437 = vrsqrt.f32 %v630_v3  ;;  %v337_v49 = vmul.f32 %v335_v18, %v335_v18  ;;  %v154_v62 = vadd.f32 %v153_v50, %v135_v26  ;;  %v284_v44 = vsel %vm604_vm4, %v196_v52, %v578_v12 }
  0x50   :  { %439 = vrsqrt.f32 %v638_v17  ;;  %v285_v5 = vsel %vm604_vm4, %v198_v53, %v583_v16  ;;  %v122_v19 = vsub.f32 %v81_v54, %v102_v55  ;;  %v211_v23 = vmul.f32 %v414_v58, %v210_v51 }
  0x51   :  { %v338_v59 = vmul.f32 %v600_v9, %v337_v49  ;;  %v155_v21 = vadd.f32 %v154_v62, %v136_v48  ;;  %v123_v24 = vsub.f32 %v82_v60, %v103_v61  ;;  %v139_v0 = vmul.f32 %v118_v47, %v118_v47 }
  0x52   :  { %v140_v6 = vmul.f32 %v119_v56, %v119_v56  ;;  %v142_v25 = vmul.f32 %v121_v63, %v121_v63  ;;  %v288_v1 = vsub.f32 %v279_v10, %v284_v44  ;;  %v289_v7 = vsub.f32 %v280_v15, %v285_v5 }
  0x53   :  { %365 = vadd.xlane.f32.xlu1 %v338_v59  ;;  %v156_v26 = vadd.f32 %v155_v21, %v137_v4  ;;  %vm296_vm5 = vcmp.eq.f32.partialorder %v626_v2, inf  ;;  %vm298_vm6 = vcmp.eq.f32.partialorder %v626_v2, 0.0  ;;  %v299_v12 = vand.u32 2147483648, %v626_v2 }
  0x54   :  { %vm303_vm7 = vcmp.eq.f32.partialorder %v634_v8, inf  ;;  %vm305_vm8 = vcmp.eq.f32.partialorder %v634_v8, 0.0  ;;  %v306_v28 = vand.u32 2147483648, %v634_v8  ;;  %vm311_vm9 = vcmp.eq.f32.partialorder %v630_v3, inf }
  0x55   :  { %v157_v27 = vadd.f32 %v156_v26, %v138_v20  ;;  %vm313_vm10 = vcmp.eq.f32.partialorder %v630_v3, 0.0  ;;  %v314_v30 = vand.u32 2147483648, %v630_v3  ;;  %vm318_vm11 = vcmp.eq.f32.partialorder %v638_v17, inf }
  0x56   :  { %vm320_vm12 = vcmp.eq.f32.partialorder %v638_v17, 0.0  ;;  %v321_v35 = vand.u32 2147483648, %v638_v17  ;;  %v325_v11 = vmul.f32 %v288_v1, %v288_v1  ;;  %v326_v18 = vmul.f32 %v289_v7, %v289_v7 }
  0x57   :  { %v434_v16 = vpop.eup %433  ;;  %375 = vadd.xlane.f32.xlu1 %v211_v23  ;;  %v158_v33 = vadd.f32 %v157_v27, %v139_v0  ;;  %v124_v46 = vsub.f32 %v83_v31, %v104_v32  ;;  %v143_v47 = vmul.f32 %v122_v19, %v122_v19  ;;  %v125_v53 = vsub.f32 %v84_v39, %v105_v40 }
  0x58   :  { %v436_v29 = vpop.eup %435  ;;  %v295_v13 = vmul.f32 %v434_v16, %v626_v2  ;;  %v144_v54 = vmul.f32 %v123_v24, %v123_v24  ;;  %v327_v57 = vadd.f32 %v326_v18, %v325_v11 }
  0x59   :  { %v438_v14 = vpop.eup %437  ;;  %v302_v34 = vmul.f32 %v436_v29, %v634_v8  ;;  %v159_v41 = vadd.f32 %v158_v33, %v140_v6  ;;  %v145_v59 = vmul.f32 %v124_v46, %v124_v46  ;;  %v146_v61 = vmul.f32 %v125_v53, %v125_v53 }
  0x5a   :  { %v440_v36 = vpop.eup %439  ;;  %v297_v37 = vsel %vm296_vm5, %v626_v2, %v295_v13  ;;  %v310_v38 = vmul.f32 %v438_v14, %v630_v3 }
  0x5b   :  { %v300_v42 = vsel %vm298_vm6, %v299_v12, %v297_v37  ;;  %v304_v43 = vsel %vm303_vm7, %v634_v8, %v302_v34  ;;  %v317_v45 = vmul.f32 %v440_v36, %v638_v17  ;;  %v160_v50 = vadd.f32 %v159_v41, %v141_v22 }
  0x5c   :  { %v307_v48 = vsel %vm305_vm8, %v306_v28, %v304_v43  ;;  %v312_v49 = vsel %vm311_vm9, %v630_v3, %v310_v38  ;;  %v384_v37 = vlaneseq }
  0x5d   :  { %v308_v51 = vsub.f32 %v300_v42, %v307_v48  ;;  %v315_v2 = vsel %vm313_vm10, %v314_v30, %v312_v49  ;;  %v319_v52 = vsel %vm318_vm11, %v638_v17, %v317_v45  ;;  %v161_v8 = vadd.f32 %v160_v50, %v142_v25 }
  0x5e   :  { %v322_v55 = vsel %vm320_vm12, %v321_v35, %v319_v52  ;;  %v385_v38 = vshrl.u32 %v384_v37, 7 }
  0x5f   :  { %v323_v56 = vsub.f32 %v315_v2, %v322_v55  ;;  %v328_v58 = vmul.f32 %v308_v51, %v308_v51  ;;  %v162_v60 = vadd.f32 %v161_v8, %v143_v47 }
  0x60   :  { %vm388_vm13 = vcmp.eq.s32.totalorder %v385_v38, 2  ;;  %vm387_vm14 = vcmp.eq.s32.totalorder %v385_v38, 1  ;;  %vm386_vm15 = vcmp.eq.s32.totalorder %v385_v38, 0 }
  0x61   :  { %v163_v63 = vadd.f32 %v162_v60, %v144_v54  ;;  %v329_v4 = vadd.f32 %v328_v58, %v327_v57  ;;  %v330_v3 = vmul.f32 %v323_v56, %v323_v56 }
  0x63   :  { %v164_v62 = vadd.f32 %v163_v63, %v145_v59  ;;  %v331_v15 = vadd.f32 %v330_v3, %v329_v4 }
  0x65   :  { %v165_v10 = vadd.f32 %v164_v62, %v146_v61  ;;  %v332_v5 = vmul.f32 %v600_v9, %v331_v15 }
  0x67   :  { %v166_v44 = vmul.f32 %v600_v9, %v165_v10 }
  0x69   :  { %345 = vadd.xlane.f32.xlu0 %v166_v44 }
  0x6d   :  { %355 = vadd.xlane.f32.xlu0 %v332_v5 }
  0xe0   :  { %v366_v17 = vpop.xlane.xlu1 %365 }
  0xe1   :  { %v367_v20 = vrot.slane %v366_v17, 4 }
  0xe3   :  { %v368_v23 = vadd.f32 %v367_v20, %v366_v17 }
  0xe4   :  { %v376_v19 = vpop.xlane.xlu1 %375 }
  0xe5   :  { %v377_v21 = vrot.slane %v376_v19, 4  ;;  %v369_v25 = vrot.slane %v368_v23, 2 }
  0xe7   :  { %v378_v6 = vadd.f32 %v377_v21, %v376_v19  ;;  %v370_v28 = vadd.f32 %v369_v25, %v368_v23 }
  0xe9   :  { %v379_v7 = vrot.slane %v378_v6, 2  ;;  %v371_v31 = vrot.slane %v370_v28, 1 }
  0xeb   :  { %v380_v29 = vadd.f32 %v379_v7, %v378_v6  ;;  %v372_v35 = vadd.f32 %v371_v31, %v370_v28 }
  0xed   :  { %v381_v33 = vrot.slane %v380_v29, 1 }
  0xef   :  { %v382_v36 = vadd.f32 %v381_v33, %v380_v29 }
  0xf6   :  { %v346_v24 = vpop.xlane.xlu0 %345 }
  0xf7   :  { %v347_v0 = vrot.slane %v346_v24, 4 }
  0xf9   :  { %v348_v22 = vadd.f32 %v347_v0, %v346_v24 }
  0xfa   :  { %v356_v26 = vpop.xlane.xlu0 %355 }
  0xfb   :  { %v349_v1 = vrot.slane %v348_v22, 2  ;;  %v357_v12 = vrot.slane %v356_v26, 4 }
  0xfd   :  { %v358_v16 = vadd.f32 %v357_v12, %v356_v26  ;;  %v350_v27 = vadd.f32 %v349_v1, %v348_v22 }
  0xff   :  { %v359_v9 = vrot.slane %v358_v16, 2  ;;  %v351_v13 = vrot.slane %v350_v27, 1 }
 0x101   :  { %v360_v30 = vadd.f32 %v359_v9, %v358_v16  ;;  %v352_v14 = vadd.f32 %v351_v13, %v350_v27 }
 0x103   :  { %415 = vpush %v352_v14  ;;  %v361_v32 = vrot.slane %v360_v30, 1 }
 0x105   :  { %v362_v34 = vadd.f32 %v361_v32, %v360_v30 }
 0x107   :  { %417 = vpush %v362_v34 }
 0x108   :  { %419 = vpush %v372_v35 }
 0x109   :  { %421 = vpush %v382_v36 }
 0x134   :  { %s416_s1 = spop %415 }
 0x135   :  { %v394_v41 = vstv %s416_s1 }
 0x138   :  { %s418_s6 = spop %417 }
 0x139   :  { %s420_s7 = spop %419  ;;  %v392_v11 = vstv %s418_s6 }
 0x13a   :  { %v389_v18 = vstv %s420_s7  ;;  %s422_s8 = spop %421 }
 0x13b   :  { %v390_v39 = vstv %s422_s8 }
 0x13c   :  { %v391_v40 = vsel %vm388_vm13, %v389_v18, %v390_v39 }
 0x13d   :  { %v393_v42 = vsel %vm387_vm14, %v392_v11, %v391_v40 }
 0x13e   :  { %v395_v43 = vsel %vm386_vm15, %v394_v41, %v393_v42 }
 0x13f   :  { %396 = vst [vmem:[#allocation11] sm:$0xff] %v395_v43 }
 0x140   :  { %496 = shalt.err (!%p493_p6)
}
 0x141   :  { %s497_s14 = scalar_lea.hbm %s713_s2, 128 }
 0x142   :  { %p498_p7 = scmp.ne.s32.totalorder %s713_s2, %s497_s14  ;;  %p501_p8 = scmp.lt.u32.totalorder %s497_s14, %s713_s2 }
 0x144   :  { %p503_p9 = pnand %p501_p8, %p498_p7 }
 0x146   :  { %506 = shalt.err (!%p503_p9)
}
 0x147   :  { %406 = dma.vmem_to_hbm [thread:$0]  %s404_s10, 128, %s713_s2, [#allocation8]  }
 0x148   :  { %511 = dma.done.wait [#allocation8], 128  }
 0x149   :  { %512 = vsyncadd [#allocation8], 4294967168 }
 0x14a   :  { %410 = vsyncpa [#allocation7], 1 }
 0x14b   :  { %411 = vsyncpa [#allocation10], 1 }
 0x14c   :  { %412 = vsyncpa [#allocation8], 1 }

</bundles_post_ra>
